<compile_context>
chip_gen: v5e
topology: v5e:2x2
jax: 0.10.0
libtpu: 0.0.40
codegen_flags: <defaults>
</compile_context>

<pallas_src>
import functools
import math

import jax
import jax.numpy as jnp
from jax.experimental import pallas as pl
from jax.experimental.pallas import tpu as pltpu

ALPHA_CHANNEL = 3
ALIVE_THRESHOLD = 0.1


def _gnca_kernel(x_ref, adj_ref, upd_ref, we_ref, wa_ref, waa_ref, b1_ref,
                 w2_ref, b2_ref, out_ref, xs_ref, *, num_steps):
    """Runs `num_steps` fused GNCA updates on a VMEM-resident (B*N, C) state."""
    f32 = jnp.float32
    bf16 = jnp.bfloat16
    C = out_ref.shape[-1]

    adj = adj_ref[...]          # (BN, BN) bf16 block-diagonal 0/1 edges (exact)
    we = we_ref[...]            # (C, H) bf16  = W1[0:C]   - W1[C:2C]
    wa = wa_ref[...]            # (C, H) bf16  = W1[C:2C]  + W1[2C:3C] - W1[3C:4C]
    waa = waa_ref[...]          # (C, H) bf16  = W1[3C:4C]
    b1 = b1_ref[...]            # (1, H) f32
    w2 = w2_ref[...]            # (H, C) bf16
    b2 = b2_ref[...]            # (1, C) f32

    # State scratch: columns [0:C] hold x, column C holds the (alpha > 0.1)
    # alive indicator so the pre-life neighbour count is fused into adj @ x.
    x0 = x_ref[...]
    xs_ref[:, :C] = x0
    xs_ref[:, C:C + 1] = (x0[:, ALPHA_CHANNEL:ALPHA_CHANNEL + 1]
                          > ALIVE_THRESHOLD).astype(f32)

    # num_steps is small & static here -> trace-time unroll.
    # TODO(synk): switch to lax.fori_loop for large step counts (code size).
    for t in range(num_steps):
        xe = xs_ref[...]                                    # (BN, C+1) f32
        x = xe[:, :C]
        alive = xe[:, C:C + 1] > 0.5                        # stored 0/1 indicator

        # perceive + pre-life mask: one MXU matmul gives adj@x and adj@alive.
        agg_e = jnp.dot(adj, xe.astype(bf16), preferred_element_type=f32)
        agg = agg_e[:, :C]                                  # adj @ x
        neigh = agg_e[:, C:C + 1]                           # adj @ 1[alive]
        pre_life = jnp.logical_or(alive, neigh > 0.0)

        agg_bf = agg.astype(bf16)
        agg2 = jnp.dot(adj, agg_bf, preferred_element_type=f32)   # adj @ adj @ x

        # GCN dense stack with grad algebra folded into precombined weights.
        h = (jnp.dot(x.astype(bf16), we, preferred_element_type=f32)
             + jnp.dot(agg_bf, wa, preferred_element_type=f32)
             + jnp.dot(agg2.astype(bf16), waa, preferred_element_type=f32)
             + b1)
        h = jnp.maximum(h, 0.0)
        dx = jnp.dot(h.astype(bf16), w2, preferred_element_type=f32) + b2

        # Stochastic update (mask precomputed on host), then life masking.
        x_new = x + dx * upd_ref[t]                         # (BN, C) f32
        post_alive = (x_new[:, ALPHA_CHANNEL:ALPHA_CHANNEL + 1]
                      > ALIVE_THRESHOLD)
        post_neigh = jnp.dot(adj, post_alive.astype(bf16),
                             preferred_element_type=f32)
        post_life = jnp.logical_or(post_alive, post_neigh > 0.0)
        life = jnp.logical_and(pre_life, post_life).astype(f32)

        x_out = x_new * life
        xs_ref[:, :C] = x_out
        xs_ref[:, C:C + 1] = (x_out[:, ALPHA_CHANNEL:ALPHA_CHANNEL + 1]
                              > ALIVE_THRESHOLD).astype(f32)

    # TODO(synk): for large B*N, pack channels lane-dense before this store
    # (C=16 -> masked vst); second-order at this size.
    out_ref[...] = xs_ref[:, :C]


def _fold_w1(w1, C):
    """Fold grad = agg - x and adj@grad = agg2 - agg into W1."""
    w_x, w_grad, w_agg, w_aggrad = (w1[0:C], w1[C:2 * C],
                                    w1[2 * C:3 * C], w1[3 * C:4 * C])
    we = w_x - w_grad
    wa = w_grad + w_agg - w_aggrad
    waa = w_aggrad
    return we, wa, waa


def _block_diag(adj):
    B, N, _ = adj.shape
    eye = jnp.eye(B, dtype=adj.dtype)
    return jnp.einsum('pq,pij->piqj', eye, adj).reshape(B * N, B * N)


def gnca_forward(x, adj, rand, params, fire_rate):
    """Runs rand.shape[0] fused GNCA steps in a single pallas_call.

    x: (B, N, C) f32, adj: (B, N, N) 0/1, rand: (T, B, N) uniforms in [0,1).
    """
    B, N, C = x.shape
    T = rand.shape[0]
    w1, b1, w2, b2 = params
    we, wa, waa = _fold_w1(w1, C)
    bf16 = jnp.bfloat16

    # Single-invocation, whole-array-VMEM path: everything (block-diag
    # adjacency, weights, state) fits trivially in VMEM at these sizes.
    # TODO(synk): for large N the (B*N)^2 adjacency must instead be tiled over
    # the neighbour axis with a reduction grid axis + pl.when accumulator and
    # an explicit vmem_limit_bytes (v7x break-even is half of v5e/v6e).
    adj_bd = _block_diag(adj).astype(bf16)                              # (BN, BN)
    upd = (rand <= fire_rate).astype(jnp.float32).reshape(T, B * N, 1)  # host-side mask
    x_flat = x.reshape(B * N, C).astype(jnp.float32)

    vmem = pl.BlockSpec(memory_space=pltpu.MemorySpace.VMEM)
    out = pl.pallas_call(
        functools.partial(_gnca_kernel, num_steps=T),
        out_shape=jax.ShapeDtypeStruct((B * N, C), jnp.float32),
        in_specs=[vmem] * 9,
        out_specs=vmem,
        scratch_shapes=[pltpu.VMEM((B * N, C + 1), jnp.float32)],
    )(x_flat, adj_bd, upd,
      we.astype(bf16), wa.astype(bf16), waa.astype(bf16),
      b1.astype(jnp.float32), w2.astype(bf16), b2.astype(jnp.float32))
    return out.reshape(B, N, C)


# ----------------------------- references ----------------------------------

def _living_mask_ref(x, adj):
    a = x[..., ALPHA_CHANNEL:ALPHA_CHANNEL + 1]
    a_row = jnp.swapaxes(a, -1, -2)
    m = jnp.max(jnp.where(adj > 0.0, a_row, -jnp.inf), axis=-1, keepdims=True)
    return jnp.maximum(m, a) > ALIVE_THRESHOLD


def gnca_reference_folded(x, adj, upd, params, *, matmul_dtype=jnp.bfloat16,
                          precision=None):
    """One GNCA step in plain JAX using the folded-weight formulation but the
    original masked-max living mask and per-batch einsums.  With bf16 operands
    it mirrors the kernel's numerics; with f32 + HIGHEST it is near-exact."""
    w1, b1, w2, b2 = params
    C = x.shape[-1]
    we, wa, waa = _fold_w1(w1, C)
    md = matmul_dtype
    adj_m = adj.astype(md)
    kw = dict(preferred_element_type=jnp.float32, precision=precision)

    pre = _living_mask_ref(x, adj)
    agg = jnp.einsum('bij,bjc->bic', adj_m, x.astype(md), **kw)
    agg2 = jnp.einsum('bij,bjc->bic', adj_m, agg.astype(md), **kw)
    h = (jnp.einsum('bnc,ch->bnh', x.astype(md), we.astype(md), **kw)
         + jnp.einsum('bnc,ch->bnh', agg.astype(md), wa.astype(md), **kw)
         + jnp.einsum('bnc,ch->bnh', agg2.astype(md), waa.astype(md), **kw)
         + b1)
    h = jnp.maximum(h, 0.0)
    dx = jnp.einsum('bnh,hc->bnc', h.astype(md), w2.astype(md), **kw) + b2
    x_new = x + dx * upd
    post = _living_mask_ref(x_new, adj)
    return x_new * jnp.logical_and(pre, post).astype(jnp.float32)


def gnca_reference_torch(x, adj, upd, params):
    """Torch-faithful single forward step in f32 (concat formulation)."""
    w1, b1, w2, b2 = params
    hp = jax.lax.Precision.HIGHEST
    pre = _living_mask_ref(x, adj)
    agg = jnp.einsum('bij,bjc->bic', adj, x, precision=hp)
    grad = agg - x
    y = jnp.concatenate([x, grad], axis=-1)
    agg_y = jnp.einsum('bij,bjc->bic', adj, y, precision=hp)
    h_in = jnp.concatenate([y, agg_y], axis=-1)
    h = jax.nn.relu(jnp.einsum('bnk,kh->bnh', h_in, w1, precision=hp) + b1)
    dx = jnp.einsum('bnh,hc->bnc', h, w2, precision=hp) + b2
    x_new = x + dx * upd        # torch does this in place; returned value below
    post = _living_mask_ref(x_new, adj)
    return x_new * jnp.logical_and(pre, post).astype(jnp.float32)


if __name__ == "__main__":
    B, N, C, H = 2, 32, 16, 256          # batch, nodes, channel_n, GCN hidden_dim
    T = 3                                # fused CA steps for the multi-step demo
    fire_rate = 0.5

    key = jax.random.PRNGKey(0)
    kx, ka, kr, k1, k2, k3, k4 = jax.random.split(key, 7)

    x = jax.random.uniform(kx, (B, N, C), jnp.float32)                  # node states
    a = (jax.random.uniform(ka, (B, N, N)) < 0.25).astype(jnp.float32)  # random graph
    adj = jnp.maximum(a, jnp.swapaxes(a, -1, -2))                       # symmetric
    adj = adj * (1.0 - jnp.eye(N, dtype=jnp.float32))                   # no self-loops
    rand = jax.random.uniform(kr, (T, B, N), jnp.float32)               # per-step rand

    # Deterministic nn.Linear-style parameter init.
    in_dim = 2 * C                       # GCN input_dim = perception size (x ++ grad)
    fan1 = 2 * in_dim                    # 'cat' connectivity: self ++ aggregated
    bound1 = 1.0 / math.sqrt(fan1)
    w1 = jax.random.uniform(k1, (fan1, H), jnp.float32, -bound1, bound1)
    b1 = jax.random.uniform(k2, (1, H), jnp.float32, -bound1, bound1)
    bound2 = 1.0 / math.sqrt(H)
    w2 = jax.random.uniform(k3, (H, C), jnp.float32, -bound2, bound2)
    b2 = jax.random.uniform(k4, (1, C), jnp.float32, -bound2, bound2)
    params = (w1, b1, w2, b2)

    upd_full = (rand <= fire_rate).astype(jnp.float32)[..., None]       # (T,B,N,1)

    # (1) Single step (the module's forward), tight check against the
    #     numerics-mirroring reference (validates the indicator-matvec mask,
    #     the block-diagonal flattening and the fused aggregation).
    out1 = jax.block_until_ready(gnca_forward(x, adj, rand[:1], params, fire_rate))
    ref1 = gnca_reference_folded(x, adj, upd_full[0], params)
    assert out1.shape == (B, N, C)
    err1 = float(jnp.max(jnp.abs(out1 - ref1)))
    assert jnp.allclose(out1, ref1, atol=2e-3, rtol=2e-3), err1

    # (2) Fused multi-step run (T steps in one pallas_call) vs. the iterated
    #     reference; magnitudes grow with steps so rtol carries the check.
    outT = jax.block_until_ready(gnca_forward(x, adj, rand, params, fire_rate))
    refT = x
    for t in range(T):
        refT = gnca_reference_folded(refT, adj, upd_full[t], params)
    errT = float(jnp.max(jnp.abs(outT - refT)))
    assert jnp.allclose(outT, refT, atol=1e-2, rtol=5e-3), errT

    # (3) The folded-weight rewrite itself vs. the torch-faithful concat
    #     formulation, both in f32 HIGHEST precision (validates the algebra).
    ref_fold32 = gnca_reference_folded(x, adj, upd_full[0], params,
                                       matmul_dtype=jnp.float32,
                                       precision=jax.lax.Precision.HIGHEST)
    ref_torch = gnca_reference_torch(x, adj, upd_full[0], params)
    err_alg = float(jnp.max(jnp.abs(ref_fold32 - ref_torch)))
    assert jnp.allclose(ref_fold32, ref_torch, atol=1e-3, rtol=1e-3), err_alg

    print("KERNEL_OK")
</pallas_src>

<mosaic_0001>
module attributes {stable_mosaic.version = 11 : i64} {
  func.func @_gnca_kernel(%arg0: memref<64x16xf32, #tpu.memory_space<vmem>>, %arg1: memref<64x64xbf16, #tpu.memory_space<vmem>>, %arg2: memref<1x64x1xf32, #tpu.memory_space<vmem>>, %arg3: memref<16x256xbf16, #tpu.memory_space<vmem>>, %arg4: memref<16x256xbf16, #tpu.memory_space<vmem>>, %arg5: memref<16x256xbf16, #tpu.memory_space<vmem>>, %arg6: memref<1x256xf32, #tpu.memory_space<vmem>>, %arg7: memref<256x16xbf16, #tpu.memory_space<vmem>>, %arg8: memref<1x16xf32, #tpu.memory_space<vmem>>, %arg9: memref<64x16xf32, #tpu.memory_space<vmem>>, %arg10: memref<64x17xf32, #tpu.memory_space<vmem>>) attributes {dimension_semantics = [], scalar_prefetch = 0 : i64, scratch_operands = 1 : i64, tpu.core_type = #tpu.core_type<tc>} {
    %c0 = arith.constant 0 : index
    %c0_0 = arith.constant 0 : index
    %0 = vector.load %arg1[%c0, %c0_0] : memref<64x64xbf16, #tpu.memory_space<vmem>>, vector<64x64xbf16>
    %c0_1 = arith.constant 0 : index
    %c0_2 = arith.constant 0 : index
    %1 = vector.load %arg3[%c0_1, %c0_2] : memref<16x256xbf16, #tpu.memory_space<vmem>>, vector<16x256xbf16>
    %c0_3 = arith.constant 0 : index
    %c0_4 = arith.constant 0 : index
    %2 = vector.load %arg4[%c0_3, %c0_4] : memref<16x256xbf16, #tpu.memory_space<vmem>>, vector<16x256xbf16>
    %c0_5 = arith.constant 0 : index
    %c0_6 = arith.constant 0 : index
    %3 = vector.load %arg5[%c0_5, %c0_6] : memref<16x256xbf16, #tpu.memory_space<vmem>>, vector<16x256xbf16>
    %c0_7 = arith.constant 0 : index
    %c0_8 = arith.constant 0 : index
    %4 = vector.load %arg6[%c0_7, %c0_8] : memref<1x256xf32, #tpu.memory_space<vmem>>, vector<1x256xf32>
    %c0_9 = arith.constant 0 : index
    %c0_10 = arith.constant 0 : index
    %5 = vector.load %arg7[%c0_9, %c0_10] : memref<256x16xbf16, #tpu.memory_space<vmem>>, vector<256x16xbf16>
    %c0_11 = arith.constant 0 : index
    %c0_12 = arith.constant 0 : index
    %6 = vector.load %arg8[%c0_11, %c0_12] : memref<1x16xf32, #tpu.memory_space<vmem>>, vector<1x16xf32>
    %c0_13 = arith.constant 0 : index
    %c0_14 = arith.constant 0 : index
    %7 = vector.load %arg0[%c0_13, %c0_14] : memref<64x16xf32, #tpu.memory_space<vmem>>, vector<64x16xf32>
    %c0_15 = arith.constant 0 : index
    %c0_16 = arith.constant 0 : index
    %8 = vector.load %arg10[%c0_15, %c0_16] : memref<64x17xf32, #tpu.memory_space<vmem>>, vector<64x16xf32>
    tpu.vector_store %arg10[%c0_15, %c0_16], %7 {strides = array<i32>} : memref<64x17xf32, #tpu.memory_space<vmem>>, vector<64x16xf32>,
    %9 = vector.extract_strided_slice %7 {offsets = [0, 3], sizes = [64, 1], strides = [1, 1]} : vector<64x16xf32> to vector<64x1xf32>
    %cst = arith.constant 1.000000e-01 : f32
    %10 = vector.broadcast %cst : f32 to vector<64x1xf32>
    %11 = arith.cmpf ogt, %9, %10 : vector<64x1xf32>
    %12 = arith.extui %11 : vector<64x1xi1> to vector<64x1xi32>
    %13 = arith.sitofp %12 : vector<64x1xi32> to vector<64x1xf32>
    %c0_17 = arith.constant 0 : index
    %c16 = arith.constant 16 : index
    %14 = vector.load %arg10[%c0_17, %c16] : memref<64x17xf32, #tpu.memory_space<vmem>>, vector<64x1xf32>
    tpu.vector_store %arg10[%c0_17, %c16], %13 {strides = array<i32>} : memref<64x17xf32, #tpu.memory_space<vmem>>, vector<64x1xf32>,
    %c0_18 = arith.constant 0 : index
    %c0_19 = arith.constant 0 : index
    %15 = vector.load %arg10[%c0_18, %c0_19] : memref<64x17xf32, #tpu.memory_space<vmem>>, vector<64x17xf32>
    %16 = vector.extract_strided_slice %15 {offsets = [0, 0], sizes = [64, 16], strides = [1, 1]} : vector<64x17xf32> to vector<64x16xf32>
    %17 = vector.extract_strided_slice %15 {offsets = [0, 16], sizes = [64, 1], strides = [1, 1]} : vector<64x17xf32> to vector<64x1xf32>
    %cst_20 = arith.constant 5.000000e-01 : f32
    %18 = vector.broadcast %cst_20 : f32 to vector<64x1xf32>
    %19 = arith.cmpf ogt, %17, %18 : vector<64x1xf32>
    %20 = arith.truncf %15 : vector<64x17xf32> to vector<64x17xbf16>
    %cst_21 = arith.constant dense<0.000000e+00> : vector<64x17xf32>
    %21 = tpu.matmul %0, %20, %cst_21 {dimension_numbers = #tpu.dot_dimension_numbers<[1], [0], [0], [1], [0, 0, 1, 1], [], []>} : vector<64x64xbf16>, vector<64x17xbf16>, vector<64x17xf32> -> vector<64x17xf32>
    %22 = vector.extract_strided_slice %21 {offsets = [0, 0], sizes = [64, 16], strides = [1, 1]} : vector<64x17xf32> to vector<64x16xf32>
    %23 = vector.extract_strided_slice %21 {offsets = [0, 16], sizes = [64, 1], strides = [1, 1]} : vector<64x17xf32> to vector<64x1xf32>
    %cst_22 = arith.constant 0.000000e+00 : f32
    %24 = vector.broadcast %cst_22 : f32 to vector<64x1xf32>
    %25 = arith.cmpf ogt, %23, %24 : vector<64x1xf32>
    %26 = arith.ori %19, %25 : vector<64x1xi1>
    %27 = arith.truncf %22 : vector<64x16xf32> to vector<64x16xbf16>
    %cst_23 = arith.constant dense<0.000000e+00> : vector<64x16xf32>
    %28 = tpu.matmul %0, %27, %cst_23 {dimension_numbers = #tpu.dot_dimension_numbers<[1], [0], [0], [1], [0, 0, 1, 1], [], []>} : vector<64x64xbf16>, vector<64x16xbf16>, vector<64x16xf32> -> vector<64x16xf32>
    %29 = arith.truncf %16 : vector<64x16xf32> to vector<64x16xbf16>
    %cst_24 = arith.constant dense<0.000000e+00> : vector<64x256xf32>
    %30 = tpu.matmul %29, %1, %cst_24 {dimension_numbers = #tpu.dot_dimension_numbers<[1], [0], [0], [1], [0, 0, 1, 1], [], []>} : vector<64x16xbf16>, vector<16x256xbf16>, vector<64x256xf32> -> vector<64x256xf32>
    %cst_25 = arith.constant dense<0.000000e+00> : vector<64x256xf32>
    %31 = tpu.matmul %27, %2, %cst_25 {dimension_numbers = #tpu.dot_dimension_numbers<[1], [0], [0], [1], [0, 0, 1, 1], [], []>} : vector<64x16xbf16>, vector<16x256xbf16>, vector<64x256xf32> -> vector<64x256xf32>
    %32 = arith.addf %30, %31 : vector<64x256xf32>
    %33 = arith.truncf %28 : vector<64x16xf32> to vector<64x16xbf16>
    %cst_26 = arith.constant dense<0.000000e+00> : vector<64x256xf32>
    %34 = tpu.matmul %33, %3, %cst_26 {dimension_numbers = #tpu.dot_dimension_numbers<[1], [0], [0], [1], [0, 0, 1, 1], [], []>} : vector<64x16xbf16>, vector<16x256xbf16>, vector<64x256xf32> -> vector<64x256xf32>
    %35 = arith.addf %32, %34 : vector<64x256xf32>
    %36 = vector.broadcast %4 : vector<1x256xf32> to vector<64x256xf32>
    %37 = arith.addf %35, %36 : vector<64x256xf32>
    %cst_27 = arith.constant 0.000000e+00 : f32
    %38 = vector.broadcast %cst_27 : f32 to vector<64x256xf32>
    %39 = arith.maximumf %37, %38 : vector<64x256xf32>
    %40 = arith.truncf %39 : vector<64x256xf32> to vector<64x256xbf16>
    %cst_28 = arith.constant dense<0.000000e+00> : vector<64x16xf32>
    %41 = tpu.matmul %40, %5, %cst_28 {dimension_numbers = #tpu.dot_dimension_numbers<[1], [0], [0], [1], [0, 0, 1, 1], [], []>} : vector<64x256xbf16>, vector<256x16xbf16>, vector<64x16xf32> -> vector<64x16xf32>
    %42 = vector.broadcast %6 : vector<1x16xf32> to vector<64x16xf32>
    %43 = arith.addf %41, %42 : vector<64x16xf32>
    %c0_29 = arith.constant 0 : index
    %c0_30 = arith.constant 0 : index
    %c0_31 = arith.constant 0 : index
    %44 = vector.load %arg2[%c0_29, %c0_30, %c0_31] : memref<1x64x1xf32, #tpu.memory_space<vmem>>, vector<1x64x1xf32>
    %45 = vector.shape_cast %44 : vector<1x64x1xf32> to vector<64x1xf32>
    %46 = vector.broadcast %45 : vector<64x1xf32> to vector<64x16xf32>
    %47 = arith.mulf %43, %46 : vector<64x16xf32>
    %48 = arith.addf %16, %47 : vector<64x16xf32>
    %49 = vector.extract_strided_slice %48 {offsets = [0, 3], sizes = [64, 1], strides = [1, 1]} : vector<64x16xf32> to vector<64x1xf32>
    %cst_32 = arith.constant 1.000000e-01 : f32
    %50 = vector.broadcast %cst_32 : f32 to vector<64x1xf32>
    %51 = arith.cmpf ogt, %49, %50 : vector<64x1xf32>
    %52 = arith.extui %51 : vector<64x1xi1> to vector<64x1xi32>
    %53 = arith.sitofp %52 : vector<64x1xi32> to vector<64x1xf32>
    %54 = arith.truncf %53 : vector<64x1xf32> to vector<64x1xbf16>
    %cst_33 = arith.constant dense<0.000000e+00> : vector<64x1xf32>
    %55 = tpu.matmul %0, %54, %cst_33 {dimension_numbers = #tpu.dot_dimension_numbers<[1], [0], [0], [1], [0, 0, 1, 1], [], []>} : vector<64x64xbf16>, vector<64x1xbf16>, vector<64x1xf32> -> vector<64x1xf32>
    %cst_34 = arith.constant 0.000000e+00 : f32
    %56 = vector.broadcast %cst_34 : f32 to vector<64x1xf32>
    %57 = arith.cmpf ogt, %55, %56 : vector<64x1xf32>
    %58 = arith.ori %51, %57 : vector<64x1xi1>
    %59 = arith.andi %26, %58 : vector<64x1xi1>
    %60 = arith.extui %59 : vector<64x1xi1> to vector<64x1xi32>
    %61 = arith.sitofp %60 : vector<64x1xi32> to vector<64x1xf32>
    %62 = vector.broadcast %61 : vector<64x1xf32> to vector<64x16xf32>
    %63 = arith.mulf %48, %62 : vector<64x16xf32>
    %c0_35 = arith.constant 0 : index
    %c0_36 = arith.constant 0 : index
    %64 = vector.load %arg10[%c0_35, %c0_36] : memref<64x17xf32, #tpu.memory_space<vmem>>, vector<64x16xf32>
    tpu.vector_store %arg10[%c0_35, %c0_36], %63 {strides = array<i32>} : memref<64x17xf32, #tpu.memory_space<vmem>>, vector<64x16xf32>,
    %65 = vector.extract_strided_slice %63 {offsets = [0, 3], sizes = [64, 1], strides = [1, 1]} : vector<64x16xf32> to vector<64x1xf32>
    %cst_37 = arith.constant 1.000000e-01 : f32
    %66 = vector.broadcast %cst_37 : f32 to vector<64x1xf32>
    %67 = arith.cmpf ogt, %65, %66 : vector<64x1xf32>
    %68 = arith.extui %67 : vector<64x1xi1> to vector<64x1xi32>
    %69 = arith.sitofp %68 : vector<64x1xi32> to vector<64x1xf32>
    %c0_38 = arith.constant 0 : index
    %c16_39 = arith.constant 16 : index
    %70 = vector.load %arg10[%c0_38, %c16_39] : memref<64x17xf32, #tpu.memory_space<vmem>>, vector<64x1xf32>
    tpu.vector_store %arg10[%c0_38, %c16_39], %69 {strides = array<i32>} : memref<64x17xf32, #tpu.memory_space<vmem>>, vector<64x1xf32>,
    %c0_40 = arith.constant 0 : index
    %c0_41 = arith.constant 0 : index
    %71 = vector.load %arg10[%c0_40, %c0_41] : memref<64x17xf32, #tpu.memory_space<vmem>>, vector<64x16xf32>
    %c0_42 = arith.constant 0 : index
    %c0_43 = arith.constant 0 : index
    %72 = vector.load %arg9[%c0_42, %c0_43] : memref<64x16xf32, #tpu.memory_space<vmem>>, vector<64x16xf32>
    tpu.vector_store %arg9[%c0_42, %c0_43], %71 {strides = array<i32>} : memref<64x16xf32, #tpu.memory_space<vmem>>, vector<64x16xf32>,
    return
  }
}

</mosaic_0001>

<bundles_post_ra>
// kernel: tpu_custom_call.1
= control target key start
LH: loop header
LB: loop body
LE: loop exit
PB: predicated region body
PF: predicated region fallthrough
CT: control target
= control target key end

     0   :  { %vm89_vm0 = vcmask 130048   ;;  %v1417_v4 = vmov 0.0   ;;  %s1418_s23 = smov 13   ;;  %vm154_vm9 = vcmask 138368   ;;  %vm203_vm10 = vcmask 523264   ;;  %s1421_s11 = smov 3   ;;  %s2026_s0 = inlined_call_operand.vmem [shape: f32[64,16], index: 0, kind: input, shape index: {}]   ;;  %s2027_s3 = inlined_call_operand.vmem [shape: bf16[16,256], index: 3, kind: input, shape index: {}]   ;;  %s2028_s1 = inlined_call_operand.vmem [shape: bf16[64,64], index: 1, kind: input, shape index: {}]   ;;  %s2029_s4 = inlined_call_operand.vmem [shape: bf16[16,256], index: 4, kind: input, shape index: {}]   ;;  %s2030_s5 = inlined_call_operand.vmem [shape: bf16[16,256], index: 5, kind: input, shape index: {}]   ;;  %s2031_s7 = inlined_call_operand.vmem [shape: bf16[256,16], index: 7, kind: input, shape index: {}]   ;;  %s2032_s8 = inlined_call_operand.vmem [shape: f32[1,16], index: 8, kind: input, shape index: {}]   ;;  %s2033_s6 = inlined_call_operand.vmem [shape: f32[1,256], index: 6, kind: input, shape index: {}]   ;;  %s2034_s2 = inlined_call_operand.vmem [shape: f32[1,64,1], index: 2, kind: input, shape index: {}]   ;;  %s2035_s9 = inlined_call_operand.vmem [shape: f32[64,16], index: 9, kind: output, shape index: {}]  }
   0x1   :  { %v87_v0 = vld [vmem:[%s2026_s0 + $0x30] sm:$0xff]  ;;  %v88_v1 = vld [vmem:[%s2026_s0 + $0x38] sm:$0xff]  ;;  %v85_v2 = vld [vmem:[%s2026_s0 + $0x20] sm:$0xff] }
   0x2   :  { %97 = vst.msk [vmem:[#allocation2 + $0x38] sm:$0xff] %vm89_vm0, %v88_v1  ;;  %vm104_vm1 = vcmp.gt.f32.partialorder %v87_v0, 0.1  ;;  %vm105_vm2 = vcmp.gt.f32.partialorder %v88_v1, 0.1  ;;  %v86_v3 = vld [vmem:[%s2026_s0 + $0x28] sm:$0xff] }
   0x3   :  { %v1143_v5 = vsel %vm104_vm1, 1.0, %v1417_v4  ;;  %v1144_v6 = vsel %vm105_vm2, 1.0, %v1417_v4  ;;  %96 = vst.msk [vmem:[#allocation2 + $0x30] sm:$0xff] %vm89_vm0, %v87_v0  ;;  %vm102_vm3 = vcmp.gt.f32.partialorder %v85_v2, 0.1  ;;  %v83_v7 = vld [vmem:[%s2026_s0 + $0x10] sm:$0xff] }
   0x4   :  { %v1346_v8 = vpack.i.bf16 %v1144_v6, %v1143_v5  ;;  %95 = vst.msk [vmem:[#allocation2 + $0x28] sm:$0xff] %vm89_vm0, %v86_v3  ;;  %vm103_vm4 = vcmp.gt.f32.partialorder %v86_v3, 0.1  ;;  %v84_v9 = vld [vmem:[%s2026_s0 + $0x18] sm:$0xff]  ;;  %v81_v10 = vld [vmem:[%s2026_s0] sm:$0xff]  ;;  %v1141_v11 = vsel %vm102_vm3, 1.0, %v1417_v4 }
   0x5   :  { %94 = vst.msk [vmem:[#allocation2 + $0x20] sm:$0xff] %vm89_vm0, %v85_v2  ;;  %vm100_vm5 = vcmp.gt.f32.partialorder %v83_v7, 0.1  ;;  %vm101_vm6 = vcmp.gt.f32.partialorder %v84_v9, 0.1  ;;  %v82_v14 = vld [vmem:[%s2026_s0 + $0x8] sm:$0xff] }
   0x6   :  { %1347 = vrot.lane.b32.xlu0 %v1346_v8, %s1418_s23  ;;  %93 = vst.msk [vmem:[#allocation2 + $0x18] sm:$0xff] %vm89_vm0, %v84_v9  ;;  %v1139_v12 = vsel %vm100_vm5, 1.0, %v1417_v4  ;;  %v1140_v13 = vsel %vm101_vm6, 1.0, %v1417_v4  ;;  %v1142_v15 = vsel %vm103_vm4, 1.0, %v1417_v4  ;;  %vm98_vm7 = vcmp.gt.f32.partialorder %v81_v10, 0.1 }
   0x7   :  { %v1356_v16 = vpack.i.bf16 %v1140_v13, %v1139_v12  ;;  %92 = vst.msk [vmem:[#allocation2 + $0x10] sm:$0xff] %vm89_vm0, %v83_v7  ;;  %vm99_vm8 = vcmp.gt.f32.partialorder %v82_v14, 0.1  ;;  %v1351_v17 = vpack.i.bf16 %v1142_v15, %v1141_v11  ;;  %v1137_v18 = vsel %vm98_vm7, 1.0, %v1417_v4  ;;  %v1187_v44 = vld [vmem:[%s2027_s3] sm:$0xf] }
   0x8   :  { %91 = vst.msk [vmem:[#allocation2 + $0x8] sm:$0xff] %vm89_vm0, %v82_v14  ;;  %v1138_v19 = vsel %vm99_vm8, 1.0, %v1417_v4  ;;  %v1314_v45 = vld [vmem:[%s2027_s3 + $0x4] sm:$0xf0]  ;;  %v1570_v48 = vld [vmem:[%s2028_s1] sm:$0xff]  ;;  %v1584_v50 = vld [vmem:[%s2028_s1 + $0x10] sm:$0xff] }
   0x9   :  { %1357 = vrot.lane.b32.xlu1 %v1356_v16, %s1418_s23  ;;  %90 = vst.msk [vmem:[#allocation2] sm:$0xff] %vm89_vm0, %v81_v10  ;;  %v1361_v20 = vpack.i.bf16 %v1138_v19, %v1137_v18  ;;  %v1188_v47 = vor.u32 %v1314_v45, %v1187_v44  ;;  %v1575_v49 = vld [vmem:[%s2028_s1 + $0x8] sm:$0xff]  ;;  %v1592_v51 = vld [vmem:[%s2028_s1 + $0x18] sm:$0xff]  ;;  %v1171_v52 = vld [vmem:[%s2029_s4] sm:$0xf] }
   0xa   :  { %v1316_v53 = vld [vmem:[%s2029_s4 + $0x4] sm:$0xf0]  ;;  %v1315_v54 = vld [vmem:[%s2029_s4 + $0x4] sm:$0xf]  ;;  %v1173_v56 = vld [vmem:[%s2029_s4 + $0x8] sm:$0xf0] }
   0xb   :  { %v1172_v55 = vor.u32 %v1316_v53, %v1171_v52  ;;  %v1176_v57 = vor.u32 %v1315_v54, %v1173_v56  ;;  %v1313_v2 = vld [vmem:[%s2027_s3 + $0x4] sm:$0xf]  ;;  %v1189_v3 = vld [vmem:[%s2027_s3 + $0x8] sm:$0xf0]  ;;  %v1203_v13 = vld [vmem:[%s2030_s5] sm:$0xf] }
   0xc   :  { %v1192_v5 = vor.u32 %v1313_v2, %v1189_v3  ;;  %v1317_v10 = vld [vmem:[%s2030_s5 + $0x4] sm:$0xf]  ;;  %v1205_v11 = vld [vmem:[%s2030_s5 + $0x8] sm:$0xf0]  ;;  %v1318_v14 = vld [vmem:[%s2030_s5 + $0x4] sm:$0xf0] }
   0xd   :  { %323 = vmatpush.bf16.msra.mxu2 %v1172_v55  ;;  %352 = vmatpush.bf16.msra.mxu3 %v1176_v57  ;;  %v1208_v12 = vor.u32 %v1317_v10, %v1205_v11  ;;  %v1204_v15 = vor.u32 %v1318_v14, %v1203_v13  ;;  %v1323_v45 = vld [vmem:[%s2031_s7 + $0x20] sm:$0xff]  ;;  %v1330_v2 = vld [vmem:[%s2031_s7 + $0x58] sm:$0xff]  ;;  %v1329_v10 = vld [vmem:[%s2031_s7 + $0x50] sm:$0xff] }
   0xe   :  { %1352 = vrot.lane.b32.xlu0 %v1351_v17, %s1418_s23  ;;  %v1320_v11 = vld [vmem:[%s2031_s7 + $0x8] sm:$0xff] }
  0x11   :  { %1362 = vrot.lane.b32.xlu1 %v1361_v20, %s1418_s23  ;;  %1339 = vmatpush.bf16.msrb.mxu2 %v1188_v47 }
  0x12   :  { %432 = vmatpush.bf16.msrb.mxu3 %v1192_v5 }
  0x78   :  { %v1348_v21 = vpop.permute.xlu0 %1347 }
  0x79   :  { %v1350_v22 = vunpack.i.h.bf16 %v1348_v21  ;;  %v1349_v23 = vunpack.i.l.bf16 %v1348_v21 }
  0x7b   :  { %162 = vst.msk [vmem:[#allocation2 + $0x38] sm:$0xff] %vm154_vm9, %v1350_v22  ;;  %v1358_v24 = vpop.permute.xlu1 %1357 }
  0x7c   :  { %161 = vst.msk [vmem:[#allocation2 + $0x30] sm:$0xff] %vm154_vm9, %v1349_v23  ;;  %v1360_v25 = vunpack.i.h.bf16 %v1358_v24  ;;  %v1359_v26 = vunpack.i.l.bf16 %v1358_v24 }
  0x7e   :  { %158 = vst.msk [vmem:[#allocation2 + $0x18] sm:$0xff] %vm154_vm9, %v1360_v25 }
  0x7f   :  { %157 = vst.msk [vmem:[#allocation2 + $0x10] sm:$0xff] %vm154_vm9, %v1359_v26 }
  0x80   :  { %v1353_v27 = vpop.permute.xlu0 %1352 }
  0x81   :  { %v1355_v28 = vunpack.i.h.bf16 %v1353_v27  ;;  %v1354_v29 = vunpack.i.l.bf16 %v1353_v27 }
  0x82   :  { %v1521_v30 = vld [vmem:[#allocation2 + $0x38] sm:$0xff] }
  0x83   :  { %160 = vst.msk [vmem:[#allocation2 + $0x28] sm:$0xff] %vm154_vm9, %v1355_v28  ;;  %v1524_v31 = vld [vmem:[#allocation2 + $0x30] sm:$0xff]  ;;  %v1363_v32 = vpop.permute.xlu1 %1362  ;;  %v1326_v28 = vld [vmem:[%s2031_s7 + $0x38] sm:$0xff] }
  0x84   :  { %159 = vst.msk [vmem:[#allocation2 + $0x20] sm:$0xff] %vm154_vm9, %v1354_v29  ;;  %v1529_v33 = vpack.c.bf16 %v1521_v30, %v1524_v31  ;;  %v1365_v34 = vunpack.i.h.bf16 %v1363_v32  ;;  %v1364_v35 = vunpack.i.l.bf16 %v1363_v32  ;;  %v1334_v29 = vld [vmem:[%s2031_s7 + $0x78] sm:$0xff]  ;;  %v1325_v32 = vld [vmem:[%s2031_s7 + $0x30] sm:$0xff] }
  0x85   :  { %v1545_v40 = vld [vmem:[#allocation2 + $0x18] sm:$0xff] }
  0x86   :  { %220 = vmatpush.bf16.msra.mxu0 %v1529_v33  ;;  %1335 = vmatpush.bf16.msra.mxu1 %v1529_v33  ;;  %156 = vst.msk [vmem:[#allocation2 + $0x8] sm:$0xff] %vm154_vm9, %v1365_v34  ;;  %v1543_v39 = vld [vmem:[#allocation2 + $0x10] sm:$0xff] }
  0x87   :  { %155 = vst.msk [vmem:[#allocation2] sm:$0xff] %vm154_vm9, %v1364_v35  ;;  %v1555_v43 = vpack.c.bf16 %v1545_v40, %v1543_v39  ;;  %v1324_v35 = vld [vmem:[%s2031_s7 + $0x28] sm:$0xff] }
  0x8a   :  { %v1535_v36 = vld [vmem:[#allocation2 + $0x28] sm:$0xff] }
  0x8b   :  { %v1537_v37 = vld [vmem:[#allocation2 + $0x20] sm:$0xff] }
  0x8c   :  { %v1541_v38 = vpack.c.bf16 %v1535_v36, %v1537_v37 }
  0x8d   :  { %v1551_v42 = vld [vmem:[#allocation2 + $0x8] sm:$0xff] }
  0x8e   :  { %221 = vmatpush.bf16.msra.mxu0 %v1541_v38  ;;  %1336 = vmatpush.bf16.msra.mxu1 %v1541_v38  ;;  %v1549_v41 = vld [vmem:[#allocation2] sm:$0xff] }
  0x8f   :  { %v179_v46 = vpack.c.bf16 %v1551_v42, %v1549_v41 }
  0x92   :  { %222 = vmatpush.bf16.msra.mxu0 %v1555_v43  ;;  %1337 = vmatpush.bf16.msra.mxu1 %v1555_v43 }
  0x96   :  { %223 = vmatpush.bf16.msra.mxu0 %v179_v46  ;;  %1338 = vmatpush.bf16.msra.mxu1 %v179_v46 }
  0x99   :  { %1161 = vmatmul.msk.bf16.vlgmr.msra.gmra.mxu0 %vm203_vm10, %v1570_v48  ;;  %1162 = vmatmul.msk.bf16.vlgmr.msra.gmra.mxu1 %vm203_vm10, %v1575_v49 }
  0x9a   :  { %403 = vmatpush.bf16.msrb.mxu0 %v1188_v47 }
  0x9e   :  { %487 = vmatpush.bf16.msra.mxu0 %v1204_v15  ;;  %v1319_v15 = vld [vmem:[%s2031_s7] sm:$0xff] }
  0xa9   :  { %1163 = vmatmul.msk.bf16.gmra.mxu1 %vm203_vm10, %v1584_v50  ;;  %1193 = vmatmul.msk.bf16.vlgmr.msrb.gmra.mxu0 %vm89_vm0, %v179_v46 }
  0xb9   :  { %1164 = vmatmul.msk.bf16.gmra.mxu1 %vm203_vm10, %v1592_v51  ;;  %1194 = vmatmul.msk.bf16.gmra.mxu0 %vm89_vm0, %v1555_v43 }
 0x116   :  { %v1610_v58 = vpop.f32.mrf.mxu0  ;;  %v1612_v59 = vpop.f32.mrf.mxu1 }
 0x11e   :  { %v1614_v60 = vpop.f32.mrf.mxu0  ;;  %v1616_v61 = vpop.f32.mrf.mxu1 }
 0x11f   :  { %v261_v62 = vpack.c.bf16 %v1614_v60, %v1610_v58  ;;  %v262_v1 = vpack.c.bf16 %v1616_v61, %v1612_v59 }
 0x121   :  { %1177 = vmatmul.msk.bf16.vlgmr.msra.gmra.mxu2 %vm89_vm0, %v261_v62  ;;  %1181 = vmatmul.msk.bf16.vlgmr.msra.gmra.mxu3 %vm89_vm0, %v261_v62 }
 0x122   :  { %698 = vmatpush.bf16.msra.mxu2 %v1326_v28  ;;  %727 = vmatpush.bf16.msra.mxu3 %v1334_v29 }
 0x126   :  { %v1622_v63 = vpop.f32.mrf.mxu1  ;;  %699 = vmatpush.bf16.msra.mxu2 %v1325_v32 }
 0x12a   :  { %700 = vmatpush.bf16.msra.mxu2 %v1324_v35 }
 0x12e   :  { %v1624_v0 = vpop.f32.mrf.mxu1  ;;  %701 = vmatpush.bf16.msra.mxu2 %v1323_v45  ;;  %v1419_v45 = vmov 0  }
 0x12f   :  { %v263_v8 = vpack.c.bf16 %v1624_v0, %v1622_v63  ;;  %1367 = vset.pattern.permute.xlu0 %v1419_v45  ;;  %1366 = vset.pattern.permute.xlu2 %v1419_v45 }
 0x130   :  { %1368 = vset.pattern.permute.xlu1 %v1419_v45 }
 0x131   :  { %1178 = vmatmul.msk.bf16.gmra.mxu2 %vm89_vm0, %v262_v1  ;;  %1182 = vmatmul.msk.bf16.gmra.mxu3 %vm89_vm0, %v262_v1 }
 0x136   :  { %v1636_v6 = vpop.f32.mrf.mxu1 }
 0x13e   :  { %v1638_v7 = vpop.f32.mrf.mxu1 }
 0x13f   :  { %v264_v9 = vpack.c.bf16 %v1638_v7, %v1636_v6 }
 0x141   :  { %269 = vmatpush.bf16.msrb.mxu1 %v264_v9  ;;  %1179 = vmatmul.msk.bf16.gmra.mxu2 %vm89_vm0, %v263_v8 }
 0x142   :  { %1183 = vmatmul.msk.bf16.gmra.mxu3 %vm89_vm0, %v263_v8 }
 0x145   :  { %270 = vmatpush.bf16.msrb.mxu1 %v263_v8 }
 0x149   :  { %271 = vmatpush.bf16.msrb.mxu1 %v262_v1  ;;  %v1322_v1 = vld [vmem:[%s2031_s7 + $0x18] sm:$0xff] }
 0x14a   :  { %702 = vmatpush.bf16.msra.mxu2 %v1322_v1 }
 0x14d   :  { %272 = vmatpush.bf16.msrb.mxu1 %v261_v62  ;;  %v405_v62 = vpop.f32.mrf.mxu0 }
 0x150   :  { %1165 = vmatmul.msk.bf16.vlgmr.msrb.gmra.mxu1 %vm203_vm10, %v1570_v48 }
 0x151   :  { %1180 = vmatmul.msk.bf16.gmra.mxu2 %vm89_vm0, %v264_v9  ;;  %516 = vmatpush.bf16.msra.mxu1 %v1208_v12  ;;  %v1328_v12 = vld [vmem:[%s2031_s7 + $0x48] sm:$0xff] }
 0x152   :  { %1184 = vmatmul.msk.bf16.gmra.mxu3 %vm89_vm0, %v264_v9  ;;  %v1321_v9 = vld [vmem:[%s2031_s7 + $0x10] sm:$0xff] }
 0x153   :  { %703 = vmatpush.bf16.msra.mxu2 %v1321_v9 }
 0x155   :  { %v407_v8 = vpop.f32.mrf.mxu0 }
 0x157   :  { %704 = vmatpush.bf16.msra.mxu2 %v1320_v11 }
 0x15b   :  { %705 = vmatpush.bf16.msra.mxu2 %v1319_v15 }
 0x160   :  { %1166 = vmatmul.msk.bf16.gmra.mxu1 %vm203_vm10, %v1575_v49 }
 0x161   :  { %1195 = vmatmul.msk.bf16.vlgmr.msrb.gmra.mxu2 %vm89_vm0, %v1541_v38 }
 0x162   :  { %1197 = vmatmul.msk.bf16.vlgmr.msrb.gmra.mxu3 %vm89_vm0, %v179_v46  ;;  %v1331_v46 = vld [vmem:[%s2031_s7 + $0x60] sm:$0xff] }
 0x170   :  { %1167 = vmatmul.msk.bf16.gmra.mxu1 %vm203_vm10, %v1584_v50 }
 0x171   :  { %1196 = vmatmul.msk.bf16.gmra.mxu2 %vm89_vm0, %v1529_v33 }
 0x172   :  { %1198 = vmatmul.msk.bf16.gmra.mxu3 %vm89_vm0, %v1555_v43 }
 0x180   :  { %1168 = vmatmul.msk.bf16.gmra.mxu1 %vm203_vm10, %v1592_v51 }
 0x182   :  { %1199 = vmatmul.msk.bf16.gmra.mxu3 %vm89_vm0, %v1541_v38  ;;  %v1332_v38 = vld [vmem:[%s2031_s7 + $0x68] sm:$0xff] }
 0x192   :  { %1200 = vmatmul.msk.bf16.gmra.mxu3 %vm89_vm0, %v1529_v33  ;;  %v1333_v33 = vld [vmem:[%s2031_s7 + $0x70] sm:$0xff] }
 0x193   :  { %728 = vmatpush.bf16.msra.mxu3 %v1333_v33 }
 0x197   :  { %729 = vmatpush.bf16.msra.mxu3 %v1332_v38  ;;  %v762_v38 = vld [vmem:[%s2034_s2 + $0x30] sm:$0xff] }
 0x198   :  { %796 = vperm.xlu2 %1366, %v762_v38  }
 0x19b   :  { %730 = vmatpush.bf16.msra.mxu3 %v1331_v46 }
 0x19f   :  { %731 = vmatpush.bf16.msra.mxu3 %v1330_v2 }
 0x1a3   :  { %732 = vmatpush.bf16.msra.mxu3 %v1329_v10 }
 0x1a4   :  { %v1683_v23 = vpop.f32.mrf.mxu3  ;;  %v325_v52 = vpop.f32.mrf.mxu2 }
 0x1a5   :  { %v406_v28 = vadd.f32 %v405_v62, %v325_v52 }
 0x1a7   :  { %733 = vmatpush.bf16.msra.mxu3 %v1328_v12 }
 0x1ac   :  { %v1687_v26 = vpop.f32.mrf.mxu3  ;;  %v327_v54 = vpop.f32.mrf.mxu2 }
 0x1b4   :  { %v1707_v43 = vpop.f32.mrf.mxu3  ;;  %v1723_v56 = vpop.f32.mrf.mxu2 }
 0x1bc   :  { %v1717_v47 = vpop.f32.mrf.mxu3  ;;  %v1733_v3 = vpop.f32.mrf.mxu2 }
 0x1c4   :  { %v1749_v13 = vpop.f32.mrf.mxu2 }
 0x1c5   :  { %v1719_v53 = vpop.f32.mrf.mxu3 }
 0x1cd   :  { %v274_v16 = vpop.f32.mrf.mxu1  ;;  %v1721_v55 = vpop.f32.mrf.mxu3 }
 0x1d5   :  { %v276_v17 = vpop.f32.mrf.mxu1  ;;  %v1725_v57 = vpop.f32.mrf.mxu3 }
 0x1d6   :  { %v454_v18 = vpack.c.bf16 %v276_v17, %v274_v16  ;;  %v1327_v16 = vld [vmem:[%s2031_s7 + $0x40] sm:$0xff]  ;;  %v410_v17 = vpop.f32.mrf.mxu0 }
 0x1d7   :  { %734 = vmatpush.bf16.msra.mxu3 %v1327_v16 }
 0x1d8   :  { %1209 = vmatmul.msk.bf16.vlgmr.msra.gmra.mxu0 %vm89_vm0, %v454_v18  ;;  %1213 = vmatmul.msk.bf16.vlgmr.msra.gmra.mxu1 %vm89_vm0, %v454_v18  ;;  %v1757_v18 = vpop.f32.mrf.mxu2 }
 0x1dd   :  { %v279_v19 = vpop.f32.mrf.mxu1  ;;  %v1735_v5 = vpop.f32.mrf.mxu3 }
 0x1e5   :  { %v281_v20 = vpop.f32.mrf.mxu1  ;;  %v434_v14 = vpop.f32.mrf.mxu3 }
 0x1e6   :  { %v455_v21 = vpack.c.bf16 %v281_v20, %v279_v19  ;;  %v412_v20 = vpop.f32.mrf.mxu0  ;;  %v435_v29 = vadd.f32 %v434_v14, %v1683_v23  ;;  %v408_v23 = vadd.f32 %v407_v8, %v327_v54 }
 0x1e8   :  { %1210 = vmatmul.msk.bf16.gmra.mxu0 %vm89_vm0, %v455_v21  ;;  %1214 = vmatmul.msk.bf16.gmra.mxu1 %vm89_vm0, %v455_v21 }
 0x1ed   :  { %v284_v22 = vpop.f32.mrf.mxu1  ;;  %v436_v19 = vpop.f32.mrf.mxu3 }
 0x1ee   :  { %v437_v46 = vadd.f32 %v436_v19, %v1687_v26  ;;  %v763_v19 = vld [vmem:[%s2034_s2 + $0x38] sm:$0xff] }
 0x1ef   :  { %801 = vperm.xlu2 %1366, %v763_v19  }
 0x1f5   :  { %v286_v24 = vpop.f32.mrf.mxu1 }
 0x1f6   :  { %v456_v25 = vpack.c.bf16 %v286_v24, %v284_v22  ;;  %v1759_v24 = vpop.f32.mrf.mxu2 }
 0x1f8   :  { %1211 = vmatmul.msk.bf16.gmra.mxu0 %vm89_vm0, %v456_v25  ;;  %1215 = vmatmul.msk.bf16.gmra.mxu1 %vm89_vm0, %v456_v25  ;;  %v439_v25 = vpop.f32.mrf.mxu3 }
 0x1fd   :  { %v289_v27 = vpop.f32.mrf.mxu1 }
 0x1fe   :  { %v1781_v11 = vpop.f32.mrf.mxu2 }
 0x200   :  { %v441_v12 = vpop.f32.mrf.mxu3 }
 0x205   :  { %v291_v34 = vpop.f32.mrf.mxu1 }
 0x206   :  { %v457_v44 = vpack.c.bf16 %v291_v34, %v289_v27  ;;  %v47_v27 = vld [vmem:[%s2033_s6] sm:$0x3]  ;;  %v415_v38 = vpop.f32.mrf.mxu2 }
 0x207   :  { %v1765_v32 = vperm.slane %v47_v27, 0  ;;  %v1767_v35 = vperm.slane %v47_v27, 1 }
 0x208   :  { %1212 = vmatmul.msk.bf16.gmra.mxu0 %vm89_vm0, %v457_v44  ;;  %1216 = vmatmul.msk.bf16.gmra.mxu1 %vm89_vm0, %v457_v44  ;;  %v760_v44 = vld [vmem:[%s2034_s2 + $0x20] sm:$0xff] }
 0x209   :  { %786 = vperm.xlu0 %1367, %v760_v44   ;;  %v444_v44 = vpop.f32.mrf.mxu3 }
 0x255   :  { %v489_v21 = vpop.f32.mrf.mxu0  ;;  %v518_v22 = vpop.f32.mrf.mxu1 }
 0x256   :  { %v538_v33 = vadd.f32 %v489_v21, %v406_v28  ;;  %v539_v34 = vadd.f32 %v518_v22, %v435_v29  ;;  %v757_v21 = vld [vmem:[%s2034_s2 + $0x8] sm:$0xff] }
 0x257   :  { %771 = vperm.xlu0 %1367, %v757_v21  }
 0x258   :  { %v559_v1 = vadd.f32 %v1765_v32, %v538_v33  ;;  %v560_v2 = vadd.f32 %v1767_v35, %v539_v34  ;;  %v411_v33 = vadd.f32 %v410_v17, %v1723_v56  ;;  %v440_v34 = vadd.f32 %v439_v25, %v1707_v43 }
 0x25a   :  { %v575_v26 = vmax.f32 %v559_v1, 0.0  ;;  %v576_v8 = vmax.f32 %v560_v2, 0.0  ;;  %v413_v1 = vadd.f32 %v412_v20, %v1733_v3  ;;  %v442_v2 = vadd.f32 %v441_v12, %v1717_v47  ;;  %v756_v47 = vld [vmem:[%s2034_s2] sm:$0xff]  ;;  %v759_v3 = vld [vmem:[%s2034_s2 + $0x18] sm:$0xff]  ;;  %v417_v20 = vpop.f32.mrf.mxu2  ;;  %v446_v12 = vpop.f32.mrf.mxu3 }
 0x25d   :  { %v491_v52 = vpop.f32.mrf.mxu0  ;;  %v520_v62 = vpop.f32.mrf.mxu1 }
 0x25e   :  { %v540_v9 = vadd.f32 %v491_v52, %v408_v23  ;;  %v541_v10 = vadd.f32 %v520_v62, %v437_v46  ;;  %v758_v52 = vld [vmem:[%s2034_s2 + $0x10] sm:$0xff]  ;;  %v761_v62 = vld [vmem:[%s2034_s2 + $0x28] sm:$0xff] }
 0x25f   :  { %791 = vperm.xlu1 %1368, %v761_v62   ;;  %776 = vperm.xlu2 %1366, %v758_v52  }
 0x260   :  { %v561_v14 = vadd.f32 %v1765_v32, %v540_v9  ;;  %v562_v54 = vadd.f32 %v1767_v35, %v541_v10 }
 0x262   :  { %v577_v15 = vmax.f32 %v561_v14, 0.0  ;;  %v578_v16 = vmax.f32 %v562_v54, 0.0 }
 0x264   :  { %v591_v22 = vpack.c.bf16 %v577_v15, %v575_v26  ;;  %v592_v27 = vpack.c.bf16 %v578_v16, %v576_v8 }
 0x265   :  { %v494_v28 = vpop.f32.mrf.mxu0  ;;  %v523_v29 = vpop.f32.mrf.mxu1 }
 0x266   :  { %706 = vmatmul.bf16.vlgmr.msra.gmra.mxu2 %v591_v22  ;;  %735 = vmatmul.bf16.vlgmr.msra.gmra.mxu3 %v592_v27  ;;  %v542_v23 = vadd.f32 %v494_v28, %v411_v33  ;;  %v543_v46 = vadd.f32 %v523_v29, %v440_v34  ;;  %v416_v28 = vadd.f32 %v415_v38, %v1749_v13 }
 0x267   :  { %781 = vperm.xlu1 %1368, %v759_v3   ;;  %766 = vperm.xlu2 %1366, %v756_v47   ;;  %v445_v29 = vadd.f32 %v444_v44, %v1719_v53 }
 0x268   :  { %v563_v17 = vadd.f32 %v1765_v32, %v542_v23  ;;  %v564_v25 = vadd.f32 %v1767_v35, %v543_v46  ;;  %v418_v23 = vadd.f32 %v417_v20, %v1757_v18  ;;  %v447_v46 = vadd.f32 %v446_v12, %v1721_v55 }
 0x26a   :  { %v579_v26 = vmax.f32 %v563_v17, 0.0  ;;  %v580_v8 = vmax.f32 %v564_v25, 0.0  ;;  %v420_v17 = vpop.f32.mrf.mxu2  ;;  %v449_v25 = vpop.f32.mrf.mxu3 }
 0x26d   :  { %v496_v56 = vpop.f32.mrf.mxu0  ;;  %v525_v43 = vpop.f32.mrf.mxu1 }
 0x26e   :  { %v544_v9 = vadd.f32 %v496_v56, %v413_v1  ;;  %v545_v10 = vadd.f32 %v525_v43, %v442_v2 }
 0x270   :  { %v565_v14 = vadd.f32 %v1765_v32, %v544_v9  ;;  %v566_v54 = vadd.f32 %v1767_v35, %v545_v10 }
 0x272   :  { %v581_v15 = vmax.f32 %v565_v14, 0.0  ;;  %v582_v16 = vmax.f32 %v566_v54, 0.0 }
 0x274   :  { %v593_v19 = vpack.c.bf16 %v581_v15, %v579_v26  ;;  %v594_v21 = vpack.c.bf16 %v582_v16, %v580_v8  ;;  %v421_v26 = vadd.f32 %v420_v17, %v1759_v24  ;;  %v450_v8 = vadd.f32 %v449_v25, %v1725_v57  ;;  %v422_v15 = vpop.f32.mrf.mxu2  ;;  %v451_v16 = vpop.f32.mrf.mxu3 }
 0x275   :  { %v499_v22 = vpop.f32.mrf.mxu0  ;;  %v528_v27 = vpop.f32.mrf.mxu1  ;;  %v423_v20 = vadd.f32 %v422_v15, %v1781_v11  ;;  %v452_v12 = vadd.f32 %v451_v16, %v1735_v5  ;;  %v1412_v5 = vld [vmem:[%s2032_s8] ss:$0 sm:$0xff]  ;;  %s1420_s8 = smov 125  }
 0x276   :  { %711 = vmatmul.bf16.gmra.mxu2 %v593_v19  ;;  %740 = vmatmul.bf16.gmra.mxu3 %v594_v21  ;;  %v546_v33 = vadd.f32 %v499_v22, %v416_v28  ;;  %v547_v34 = vadd.f32 %v528_v27, %v445_v29 }
 0x278   :  { %v567_v1 = vadd.f32 %v1765_v32, %v546_v33  ;;  %v568_v2 = vadd.f32 %v1767_v35, %v547_v34 }
 0x27a   :  { %v583_v38 = vmax.f32 %v567_v1, 0.0  ;;  %v584_v44 = vmax.f32 %v568_v2, 0.0 }
 0x27d   :  { %v501_v52 = vpop.f32.mrf.mxu0  ;;  %v530_v62 = vpop.f32.mrf.mxu1 }
 0x27e   :  { %v548_v56 = vadd.f32 %v501_v52, %v418_v23  ;;  %v549_v43 = vadd.f32 %v530_v62, %v447_v46 }
 0x280   :  { %v569_v13 = vadd.f32 %v1765_v32, %v548_v56  ;;  %v570_v53 = vadd.f32 %v1767_v35, %v549_v43  ;;  %v797_v56 = vpop.permute.xlu2 %796 }
 0x282   :  { %v585_v9 = vmax.f32 %v569_v13, 0.0  ;;  %v586_v18 = vmax.f32 %v570_v53, 0.0 }
 0x284   :  { %v595_v10 = vpack.c.bf16 %v585_v9, %v583_v38  ;;  %v596_v55 = vpack.c.bf16 %v586_v18, %v584_v44 }
 0x285   :  { %v504_v14 = vpop.f32.mrf.mxu0  ;;  %v533_v54 = vpop.f32.mrf.mxu1 }
 0x286   :  { %716 = vmatmul.bf16.gmra.mxu2 %v595_v10  ;;  %745 = vmatmul.bf16.gmra.mxu3 %v596_v55  ;;  %v550_v47 = vadd.f32 %v504_v14, %v421_v26  ;;  %v551_v3 = vadd.f32 %v533_v54, %v450_v8 }
 0x288   :  { %v571_v22 = vadd.f32 %v1765_v32, %v550_v47  ;;  %v572_v27 = vadd.f32 %v1767_v35, %v551_v3 }
 0x28a   :  { %v587_v33 = vmax.f32 %v571_v22, 0.0  ;;  %v588_v34 = vmax.f32 %v572_v27, 0.0  ;;  %v787_v27 = vpop.permute.xlu0 %786 }
 0x28d   :  { %v506_v19 = vpop.f32.mrf.mxu0  ;;  %v535_v21 = vpop.f32.mrf.mxu1 }
 0x28e   :  { %v552_v28 = vadd.f32 %v506_v19, %v423_v20  ;;  %v553_v29 = vadd.f32 %v535_v21, %v452_v12 }
 0x290   :  { %v573_v24 = vadd.f32 %v1765_v32, %v552_v28  ;;  %v574_v57 = vadd.f32 %v1767_v35, %v553_v29  ;;  %v802_v35 = vpop.permute.xlu2 %801 }
 0x292   :  { %v589_v23 = vmax.f32 %v573_v24, 0.0  ;;  %v590_v46 = vmax.f32 %v574_v57, 0.0 }
 0x294   :  { %v597_v52 = vpack.c.bf16 %v589_v23, %v587_v33  ;;  %v598_v11 = vpack.c.bf16 %v590_v46, %v588_v34 }
 0x296   :  { %721 = vmatmul.bf16.gmra.mxu2 %v597_v52  ;;  %750 = vmatmul.bf16.gmra.mxu3 %v598_v11 }
 0x2b9   :  { %v777_v9 = vpop.permute.xlu2 %776 }
 0x2d1   :  { %v792_v25 = vpop.permute.xlu1 %791 }
 0x2d9   :  { %v782_v54 = vpop.permute.xlu1 %781 }
 0x2e9   :  { %v707_v62 = vpop.f32.mrf.mxu2  ;;  %v736_v1 = vpop.f32.mrf.mxu3 }
 0x2ea   :  { %v708_v2 = vadd.f32 %v1412_v5, %v707_v62 }
 0x2ec   :  { %v737_v43 = vadd.f32 %v736_v1, %v708_v2 }
 0x2f1   :  { %v709_v32 = vpop.f32.mrf.mxu2  ;;  %v738_v17 = vpop.f32.mrf.mxu3 }
 0x2f9   :  { %v712_v13 = vpop.f32.mrf.mxu2  ;;  %v741_v53 = vpop.f32.mrf.mxu3 }
 0x2fa   :  { %v713_v38 = vadd.f32 %v1412_v5, %v712_v13  ;;  %v710_v13 = vadd.f32 %v1412_v5, %v709_v32 }
 0x2fc   :  { %v742_v44 = vadd.f32 %v741_v53, %v713_v38  ;;  %v739_v38 = vadd.f32 %v738_v17, %v710_v13 }
 0x2fe   :  { %v806_v18 = vmul.f32 %v777_v9, %v742_v44  ;;  %v772_v9 = vpop.permute.xlu0 %771 }
 0x300   :  { %v1831_v26 = vadd.f32 %v806_v18, %v1543_v39 }
 0x301   :  { %v714_v10 = vpop.f32.mrf.mxu2  ;;  %v743_v55 = vpop.f32.mrf.mxu3 }
 0x302   :  { %v715_v14 = vadd.f32 %v1412_v5, %v714_v10  ;;  %vm822_vm11 = vcmp.gt.f32.partialorder %v1831_v26, 0.1 }
 0x303   :  { %v1283_v12 = vsel %vm822_vm11, 1.0, %v1417_v4 }
 0x304   :  { %v744_v8 = vadd.f32 %v743_v55, %v715_v14  ;;  %v767_v14 = vpop.permute.xlu2 %766 }
 0x306   :  { %v807_v15 = vmul.f32 %v782_v54, %v744_v8  ;;  %v805_v54 = vmul.f32 %v772_v9, %v739_v38 }
 0x308   :  { %v1834_v16 = vadd.f32 %v807_v15, %v1545_v40  ;;  %v804_v15 = vmul.f32 %v767_v14, %v737_v43 }
 0x309   :  { %v717_v47 = vpop.f32.mrf.mxu2  ;;  %v746_v3 = vpop.f32.mrf.mxu3 }
 0x30a   :  { %vm823_vm12 = vcmp.gt.f32.partialorder %v1834_v16, 0.1  ;;  %v718_v20 = vadd.f32 %v1412_v5, %v717_v47  ;;  %v1878_v43 = vadd.f32 %v804_v15, %v1549_v41 }
 0x30b   :  { %v1284_v19 = vsel %vm823_vm12, 1.0, %v1417_v4 }
 0x30c   :  { %v747_v21 = vadd.f32 %v746_v3, %v718_v20  ;;  %v845_v22 = vpack.c.bf16 %v1284_v19, %v1283_v12  ;;  %vm820_vm3 = vcmp.gt.f32.partialorder %v1878_v43, 0.1 }
 0x30d   :  { %v1281_v17 = vsel %vm820_vm3, 1.0, %v1417_v4 }
 0x30e   :  { %854 = vrot.lane.b32.xlu0 %v845_v22, %s1420_s8  ;;  %v808_v28 = vmul.f32 %v787_v27, %v747_v21 }
 0x310   :  { %v1846_v33 = vadd.f32 %v808_v28, %v1537_v37 }
 0x311   :  { %v719_v29 = vpop.f32.mrf.mxu2  ;;  %v748_v24 = vpop.f32.mrf.mxu3 }
 0x312   :  { %v720_v57 = vadd.f32 %v1412_v5, %v719_v29  ;;  %vm824_vm13 = vcmp.gt.f32.partialorder %v1846_v33, 0.1 }
 0x313   :  { %v1285_v1 = vsel %vm824_vm13, 1.0, %v1417_v4 }
 0x314   :  { %v749_v34 = vadd.f32 %v748_v24, %v720_v57 }
 0x316   :  { %v809_v23 = vmul.f32 %v792_v25, %v749_v34 }
 0x318   :  { %v1849_v46 = vadd.f32 %v809_v23, %v1535_v36 }
 0x319   :  { %v722_v52 = vpop.f32.mrf.mxu2  ;;  %v751_v11 = vpop.f32.mrf.mxu3 }
 0x31a   :  { %v723_v62 = vadd.f32 %v1412_v5, %v722_v52  ;;  %vm825_vm14 = vcmp.gt.f32.partialorder %v1849_v46, 0.1 }
 0x31b   :  { %v1286_v37 = vsel %vm825_vm14, 1.0, %v1417_v4 }
 0x31c   :  { %v752_v2 = vadd.f32 %v751_v11, %v723_v62  ;;  %v846_v25 = vpack.c.bf16 %v1286_v37, %v1285_v1 }
 0x31e   :  { %856 = vrot.lane.b32.xlu2 %v846_v25, %s1420_s8  ;;  %v810_v36 = vmul.f32 %v797_v56, %v752_v2  ;;  %v1868_v56 = vadd.f32 %v805_v54, %v1551_v42 }
 0x320   :  { %v1861_v10 = vadd.f32 %v810_v36, %v1524_v31  ;;  %vm821_vm2 = vcmp.gt.f32.partialorder %v1868_v56, 0.1 }
 0x321   :  { %v724_v53 = vpop.f32.mrf.mxu2  ;;  %v753_v18 = vpop.f32.mrf.mxu3  ;;  %v1282_v32 = vsel %vm821_vm2, 1.0, %v1417_v4 }
 0x322   :  { %v725_v44 = vadd.f32 %v1412_v5, %v724_v53  ;;  %vm826_vm15 = vcmp.gt.f32.partialorder %v1861_v10, 0.1 }
 0x323   :  { %v1287_v31 = vsel %vm826_vm15, 1.0, %v1417_v4 }
 0x324   :  { %v754_v55 = vadd.f32 %v753_v18, %v725_v44 }
 0x326   :  { %v811_v8 = vmul.f32 %v802_v35, %v754_v55  ;;  %v844_v35 = vpack.c.bf16 %v1282_v32, %v1281_v17 }
 0x328   :  { %v1864_v47 = vadd.f32 %v811_v8, %v1521_v30 }
 0x32a   :  { %vm827_vm1 = vcmp.gt.f32.partialorder %v1864_v47, 0.1 }
 0x32b   :  { %v1288_v5 = vsel %vm827_vm1, 1.0, %v1417_v4 }
 0x32c   :  { %v847_v30 = vpack.c.bf16 %v1288_v5, %v1287_v31  ;;  %v1422_v31 = vmov 16  }
 0x32d   :  { %1369 = vset.pattern.permute.xlu0 %v1422_v31  ;;  %1375 = vset.pattern.permute.xlu1 %v1422_v31 }
 0x32e   :  { %858 = vrot.lane.b32.xlu1 %v847_v30, %s1420_s8  ;;  %1381 = vset.pattern.permute.xlu2 %v1422_v31 }
 0x336   :  { %852 = vrot.lane.b32.xlu1 %v844_v35, %s1420_s8 }
 0x378   :  { %v857_v20 = vpop.permute.xlu2 %856 }
 0x380   :  { %v855_v12 = vpop.permute.xlu0 %854 }
 0x3a0   :  { %v859_v3 = vpop.permute.xlu1 %858 }
 0x3a1   :  { %868 = vmatpush.bf16.msrb.mxu0 %v859_v3 }
 0x3a5   :  { %869 = vmatpush.bf16.msrb.mxu0 %v857_v20 }
 0x3a8   :  { %v853_v19 = vpop.permute.xlu1 %852 }
 0x3a9   :  { %870 = vmatpush.bf16.msrb.mxu0 %v855_v12 }
 0x3ad   :  { %871 = vmatpush.bf16.msrb.mxu0 %v853_v19  ;;  %v1416_v19 = vld [vmem:[#allocation2 + $0x28] sm:$0xff] }
 0x3b0   :  { %1289 = vmatmul.msk.bf16.vlgmr.msrb.gmra.mxu0 %vm203_vm10, %v1570_v48 }
 0x3c0   :  { %1290 = vmatmul.msk.bf16.gmra.mxu0 %vm203_vm10, %v1575_v49 }
 0x3d0   :  { %1291 = vmatmul.msk.bf16.gmra.mxu0 %vm203_vm10, %v1584_v50 }
 0x3e0   :  { %1292 = vmatmul.msk.bf16.gmra.mxu0 %vm203_vm10, %v1592_v51 }
 0x42d   :  { %v873_v21 = vpop.f32.mrf.mxu0 }
 0x42e   :  { %vm893_vm4 = vcmp.gt.f32.partialorder %v873_v21, 0.0 }
 0x42f   :  { %v901_v22 = vsel %vm893_vm4, 1, %v1419_v45 }
 0x430   :  { %909 = vrot.lane.b32.xlu2 %v901_v22, %s1421_s11 }
 0x435   :  { %v875_v27 = vpop.f32.mrf.mxu0 }
 0x436   :  { %vm894_vm5 = vcmp.gt.f32.partialorder %v875_v27, 0.0 }
 0x437   :  { %v902_v28 = vsel %vm894_vm5, 1, %v1419_v45 }
 0x438   :  { %911 = vrot.lane.b32.xlu0 %v902_v28, %s1421_s11 }
 0x43d   :  { %v878_v48 = vpop.f32.mrf.mxu0 }
 0x43e   :  { %vm895_vm6 = vcmp.gt.f32.partialorder %v878_v48, 0.0 }
 0x43f   :  { %v903_v49 = vsel %vm895_vm6, 1, %v1419_v45 }
 0x440   :  { %913 = vrot.lane.b32.xlu1 %v903_v49, %s1421_s11 }
 0x445   :  { %v880_v50 = vpop.f32.mrf.mxu0 }
 0x446   :  { %vm896_vm7 = vcmp.gt.f32.partialorder %v880_v50, 0.0 }
 0x447   :  { %v904_v51 = vsel %vm896_vm7, 1, %v1419_v45 }
 0x448   :  { %915 = vrot.lane.b32.xlu2 %v904_v51, %s1421_s11 }
 0x44d   :  { %v883_v29 = vpop.f32.mrf.mxu0 }
 0x44e   :  { %vm897_vm8 = vcmp.gt.f32.partialorder %v883_v29, 0.0 }
 0x44f   :  { %v905_v24 = vsel %vm897_vm8, 1, %v1419_v45 }
 0x450   :  { %917 = vrot.lane.b32.xlu0 %v905_v24, %s1421_s11 }
 0x455   :  { %v885_v57 = vpop.f32.mrf.mxu0 }
 0x456   :  { %vm898_vm10 = vcmp.gt.f32.partialorder %v885_v57, 0.0 }
 0x457   :  { %v906_v34 = vsel %vm898_vm10, 1, %v1419_v45 }
 0x458   :  { %919 = vrot.lane.b32.xlu1 %v906_v34, %s1421_s11 }
 0x45d   :  { %v888_v23 = vpop.f32.mrf.mxu0 }
 0x45e   :  { %vm899_vm4 = vcmp.gt.f32.partialorder %v888_v23, 0.0 }
 0x45f   :  { %v907_v52 = vsel %vm899_vm4, 1, %v1419_v45 }
 0x460   :  { %921 = vrot.lane.b32.xlu2 %v907_v52, %s1421_s11 }
 0x465   :  { %v890_v11 = vpop.f32.mrf.mxu0 }
 0x466   :  { %vm900_vm5 = vcmp.gt.f32.partialorder %v890_v11, 0.0 }
 0x467   :  { %v908_v62 = vsel %vm900_vm5, 1, %v1419_v45 }
 0x468   :  { %923 = vrot.lane.b32.xlu0 %v908_v62, %s1421_s11 }
 0x48a   :  { %v910_v1 = vpop.permute.xlu2 %909 }
 0x48b   :  { %vm925_vm6 = vcmp.ne.s32.totalorder %v910_v1, 0 }
 0x48c   :  { %vm933_vm7 = vmor %vm820_vm3, %vm925_vm6 }
 0x48d   :  { %v941_v37 = vsel %vm933_vm7, 1, %v1419_v45 }
 0x48e   :  { %949 = vrot.lane.b32.xlu1 %v941_v37, %s1418_s23 }
 0x4a2   :  { %v916_v2 = vpop.permute.xlu2 %915 }
 0x4a3   :  { %vm928_vm8 = vcmp.ne.s32.totalorder %v916_v2, 0 }
 0x4a4   :  { %vm936_vm10 = vmor %vm823_vm12, %vm928_vm8 }
 0x4a5   :  { %v944_v25 = vsel %vm936_vm10, 1, %v1419_v45 }
 0x4a6   :  { %955 = vrot.lane.b32.xlu1 %v944_v25, %s1418_s23 }
 0x4aa   :  { %v912_v13 = vpop.permute.xlu0 %911 }
 0x4ab   :  { %vm926_vm4 = vcmp.ne.s32.totalorder %v912_v13, 0 }
 0x4ac   :  { %vm934_vm5 = vmor %vm821_vm2, %vm926_vm4 }
 0x4ad   :  { %v942_v36 = vsel %vm934_vm5, 1, %v1419_v45  ;;  %vm246_vm5 = vcmp.gt.f32.partialorder %v1614_v60, 0.0 }
 0x4ae   :  { %951 = vrot.lane.b32.xlu2 %v942_v36, %s1418_s23 }
 0x4b2   :  { %v914_v53 = vpop.permute.xlu1 %913 }
 0x4b3   :  { %vm927_vm3 = vcmp.ne.s32.totalorder %v914_v53, 0 }
 0x4b4   :  { %vm935_vm6 = vmor %vm822_vm11, %vm927_vm3  ;;  %vm171_vm3 = vcmp.gt.f32.partialorder %v1549_v41, 0.5 }
 0x4b5   :  { %v943_v38 = vsel %vm935_vm6, 1, %v1419_v45 }
 0x4b6   :  { %953 = vrot.lane.b32.xlu0 %v943_v38, %s1418_s23 }
 0x4ba   :  { %v922_v44 = vpop.permute.xlu2 %921 }
 0x4bb   :  { %vm931_vm12 = vcmp.ne.s32.totalorder %v922_v44, 0 }
 0x4bc   :  { %vm939_vm7 = vmor %vm826_vm15, %vm931_vm12 }
 0x4bd   :  { %v947_v9 = vsel %vm939_vm7, 1, %v1419_v45 }
 0x4be   :  { %961 = vrot.lane.b32.xlu1 %v947_v9, %s1418_s23 }
 0x4c2   :  { %v918_v18 = vpop.permute.xlu0 %917 }
 0x4c3   :  { %vm929_vm2 = vcmp.ne.s32.totalorder %v918_v18, 0 }
 0x4c4   :  { %vm937_vm8 = vmor %vm824_vm13, %vm929_vm2  ;;  %vm245_vm13 = vcmp.gt.f32.partialorder %v1610_v58, 0.0 }
 0x4c5   :  { %v945_v55 = vsel %vm937_vm8, 1, %v1419_v45  ;;  %vm253_vm6 = vmor %vm171_vm3, %vm245_vm13 }
 0x4c6   :  { %957 = vrot.lane.b32.xlu2 %v945_v55, %s1418_s23 }
 0x4ca   :  { %v920_v14 = vpop.permute.xlu1 %919 }
 0x4cb   :  { %vm930_vm11 = vcmp.ne.s32.totalorder %v920_v14, 0 }
 0x4cc   :  { %vm938_vm10 = vmor %vm825_vm14, %vm930_vm11  ;;  %vm248_vm11 = vcmp.gt.f32.partialorder %v1616_v61, 0.0 }
 0x4cd   :  { %v946_v54 = vsel %vm938_vm10, 1, %v1419_v45 }
 0x4ce   :  { %959 = vrot.lane.b32.xlu0 %v946_v54, %s1418_s23 }
 0x4da   :  { %v924_v8 = vpop.permute.xlu0 %923 }
 0x4db   :  { %vm932_vm15 = vcmp.ne.s32.totalorder %v924_v8, 0 }
 0x4dc   :  { %vm940_vm4 = vmor %vm827_vm1, %vm932_vm15  ;;  %vm172_vm1 = vcmp.gt.f32.partialorder %v1551_v42, 0.5  ;;  %vm247_vm15 = vcmp.gt.f32.partialorder %v1612_v59, 0.0 }
 0x4dd   :  { %v948_v15 = vsel %vm940_vm4, 1, %v1419_v45  ;;  %vm254_vm7 = vmor %vm172_vm1, %vm246_vm5  ;;  %vm174_vm4 = vcmp.gt.f32.partialorder %v1545_v40, 0.5  ;;  %vm173_vm5 = vcmp.gt.f32.partialorder %v1543_v39, 0.5  ;;  %vm251_vm1 = vcmp.gt.f32.partialorder %v1636_v6, 0.0  ;;  %v1413_v40 = vld [vmem:[#allocation2 + $0x30] sm:$0xff]  ;;  %v1414_v39 = vld [vmem:[#allocation2 + $0x38] sm:$0xff] }
 0x4de   :  { %963 = vrot.lane.b32.xlu2 %v948_v15, %s1418_s23  ;;  %vm256_vm13 = vmor %vm174_vm4, %vm248_vm11 }
 0x4df   :  { %vm255_vm3 = vmor %vm173_vm5, %vm247_vm15  ;;  %vm178_vm15 = vcmp.gt.f32.partialorder %v1414_v39, 0.5  ;;  %vm249_vm5 = vcmp.gt.f32.partialorder %v1622_v63, 0.0 }
 0x500   :  { %v950_v5 = vpop.permute.xlu1 %949 }
 0x501   :  { %vm965_vm14 = vcmp.ne.s32.totalorder %v950_v5, 0 }
 0x502   :  { %vm973_vm12 = vmand %vm253_vm6, %vm965_vm14 }
 0x503   :  { %v1293_v45 = vsel %vm973_vm12, 1.0, %v1417_v4 }
 0x508   :  { %v952_v30 = vpop.permute.xlu2 %951 }
 0x509   :  { %vm966_vm2 = vcmp.ne.s32.totalorder %v952_v30, 0 }
 0x50a   :  { %vm974_vm8 = vmand %vm254_vm7, %vm966_vm2  ;;  %vm252_vm2 = vcmp.gt.f32.partialorder %v1638_v7, 0.0  ;;  %v1415_v7 = vld [vmem:[#allocation2 + $0x20] sm:$0xff] }
 0x50b   :  { %v1294_v32 = vsel %vm974_vm8, 1.0, %v1417_v4  ;;  %vm177_vm8 = vcmp.gt.f32.partialorder %v1413_v40, 0.5  ;;  %vm260_vm4 = vmor %vm178_vm15, %vm252_vm2 }
 0x50c   :  { %v1370_v17 = vpack.i.bf16 %v1294_v32, %v1293_v45  ;;  %vm259_vm11 = vmor %vm177_vm8, %vm251_vm1  ;;  %vm176_vm8 = vcmp.gt.f32.partialorder %v1416_v19, 0.5 }
 0x50e   :  { %1371 = vperm.xlu0 %1369, %v1370_v17  }
 0x518   :  { %v956_v58 = vpop.permute.xlu1 %955 }
 0x519   :  { %vm968_vm10 = vcmp.ne.s32.totalorder %v956_v58, 0 }
 0x51a   :  { %vm976_vm14 = vmand %vm256_vm13, %vm968_vm10 }
 0x51b   :  { %v1296_v42 = vsel %vm976_vm14, 1.0, %v1417_v4 }
 0x520   :  { %v958_v61 = vpop.permute.xlu2 %957 }
 0x528   :  { %v954_v41 = vpop.permute.xlu0 %953 }
 0x529   :  { %vm967_vm6 = vcmp.ne.s32.totalorder %v954_v41, 0 }
 0x52a   :  { %vm975_vm12 = vmand %vm255_vm3, %vm967_vm6  ;;  %vm969_vm3 = vcmp.ne.s32.totalorder %v958_v61, 0  ;;  %vm250_vm6 = vcmp.gt.f32.partialorder %v1624_v0, 0.0 }
 0x52b   :  { %v1295_v60 = vsel %vm975_vm12, 1.0, %v1417_v4  ;;  %vm175_vm12 = vcmp.gt.f32.partialorder %v1415_v7, 0.5  ;;  %vm258_vm2 = vmor %vm176_vm8, %vm250_vm6 }
 0x52c   :  { %v1376_v35 = vpack.i.bf16 %v1296_v42, %v1295_v60  ;;  %vm257_vm1 = vmor %vm175_vm12, %vm249_vm5 }
 0x52e   :  { %1377 = vperm.xlu1 %1375, %v1376_v35  }
 0x530   :  { %v962_v3 = vpop.permute.xlu1 %961 }
 0x531   :  { %vm971_vm7 = vcmp.ne.s32.totalorder %v962_v3, 0 }
 0x532   :  { %vm979_vm10 = vmand %vm259_vm11, %vm971_vm7 }
 0x533   :  { %v1299_v20 = vsel %vm979_vm10, 1.0, %v1417_v4  ;;  %vm977_vm7 = vmand %vm257_vm1, %vm969_vm3 }
 0x534   :  { %v1297_v22 = vsel %vm977_vm7, 1.0, %v1417_v4 }
 0x538   :  { %v964_v59 = vpop.permute.xlu2 %963 }
 0x539   :  { %vm972_vm13 = vcmp.ne.s32.totalorder %v964_v59, 0 }
 0x53a   :  { %vm980_vm14 = vmand %vm260_vm4, %vm972_vm13 }
 0x53b   :  { %v1300_v12 = vsel %vm980_vm14, 1.0, %v1417_v4 }
 0x53c   :  { %v1387_v6 = vpack.i.bf16 %v1300_v12, %v1299_v20 }
 0x53e   :  { %1388 = vperm.xlu1 %1375, %v1387_v6  }
 0x540   :  { %v960_v21 = vpop.permute.xlu0 %959 }
 0x541   :  { %vm970_vm11 = vcmp.ne.s32.totalorder %v960_v21, 0 }
 0x542   :  { %vm978_vm15 = vmand %vm258_vm2, %vm970_vm11 }
 0x543   :  { %v1298_v27 = vsel %vm978_vm15, 1.0, %v1417_v4 }
 0x544   :  { %v1382_v63 = vpack.i.bf16 %v1298_v27, %v1297_v22 }
 0x546   :  { %1383 = vperm.xlu2 %1381, %v1382_v63  }
 0x580   :  { %v1372_v28 = vpop.permute.xlu0 %1371 }
 0x581   :  { %v1374_v48 = vunpack.i.h.bf16 %v1372_v28  ;;  %v1373_v0 = vunpack.i.l.bf16 %v1372_v28 }
 0x583   :  { %v1038_v49 = vmul.f32 %v1374_v48, %v1868_v56  ;;  %v1037_v50 = vmul.f32 %v1373_v0, %v1878_v43 }
 0x585   :  { %vm1054_vm10 = vcmp.gt.f32.partialorder %v1038_v49, 0.1  ;;  %vm1053_vm4 = vcmp.gt.f32.partialorder %v1037_v50, 0.1  ;;  %1045 = vst.msk [vmem:[#allocation2] sm:$0xff] %vm89_vm0, %v1037_v50 }
 0x586   :  { %1046 = vst.msk [vmem:[#allocation2 + $0x8] sm:$0xff] %vm89_vm0, %v1038_v49  ;;  %v1301_v51 = vsel %vm1053_vm4, 1.0, %v1417_v4  ;;  %v1302_v29 = vsel %vm1054_vm10, 1.0, %v1417_v4 }
 0x587   :  { %v1392_v24 = vpack.i.bf16 %v1302_v29, %v1301_v51 }
 0x589   :  { %1393 = vrot.lane.b32.xlu2 %v1392_v24, %s1418_s23 }
 0x5a0   :  { %v1378_v57 = vpop.permute.xlu1 %1377  ;;  %v1384_v34 = vpop.permute.xlu2 %1383 }
 0x5a1   :  { %v1380_v23 = vunpack.i.h.bf16 %v1378_v57  ;;  %v1379_v52 = vunpack.i.l.bf16 %v1378_v57  ;;  %v1386_v56 = vunpack.i.h.bf16 %v1384_v34  ;;  %v1385_v11 = vunpack.i.l.bf16 %v1384_v34 }
 0x5a3   :  { %v1040_v43 = vmul.f32 %v1380_v23, %v1834_v16  ;;  %v1039_v62 = vmul.f32 %v1379_v52, %v1831_v26  ;;  %v1042_v1 = vmul.f32 %v1386_v56, %v1849_v46  ;;  %v1041_v37 = vmul.f32 %v1385_v11, %v1846_v33 }
 0x5a5   :  { %vm1056_vm13 = vcmp.gt.f32.partialorder %v1040_v43, 0.1  ;;  %vm1055_vm14 = vcmp.gt.f32.partialorder %v1039_v62, 0.1  ;;  %1047 = vst.msk [vmem:[#allocation2 + $0x10] sm:$0xff] %vm89_vm0, %v1039_v62 }
 0x5a6   :  { %1048 = vst.msk [vmem:[#allocation2 + $0x18] sm:$0xff] %vm89_vm0, %v1040_v43  ;;  %vm1058_vm5 = vcmp.gt.f32.partialorder %v1042_v1, 0.1  ;;  %vm1057_vm3 = vcmp.gt.f32.partialorder %v1041_v37, 0.1  ;;  %v1303_v2 = vsel %vm1055_vm14, 1.0, %v1417_v4 }
 0x5a7   :  { %1049 = vst.msk [vmem:[#allocation2 + $0x20] sm:$0xff] %vm89_vm0, %v1041_v37  ;;  %v1305_v16 = vsel %vm1057_vm3, 1.0, %v1417_v4  ;;  %v1306_v26 = vsel %vm1058_vm5, 1.0, %v1417_v4  ;;  %v1304_v46 = vsel %vm1056_vm13, 1.0, %v1417_v4 }
 0x5a8   :  { %1050 = vst.msk [vmem:[#allocation2 + $0x28] sm:$0xff] %vm89_vm0, %v1042_v1  ;;  %v1402_v33 = vpack.i.bf16 %v1306_v26, %v1305_v16  ;;  %v1397_v25 = vpack.i.bf16 %v1304_v46, %v1303_v2 }
 0x5aa   :  { %1403 = vrot.lane.b32.xlu1 %v1402_v33, %s1418_s23  ;;  %1398 = vrot.lane.b32.xlu0 %v1397_v25, %s1418_s23 }
 0x5b0   :  { %v1389_v13 = vpop.permute.xlu1 %1388 }
 0x5b1   :  { %v1391_v36 = vunpack.i.h.bf16 %v1389_v13  ;;  %v1390_v53 = vunpack.i.l.bf16 %v1389_v13 }
 0x5b3   :  { %v1044_v38 = vmul.f32 %v1391_v36, %v1864_v47  ;;  %v1043_v44 = vmul.f32 %v1390_v53, %v1861_v10 }
 0x5b5   :  { %vm1060_vm6 = vcmp.gt.f32.partialorder %v1044_v38, 0.1  ;;  %vm1059_vm12 = vcmp.gt.f32.partialorder %v1043_v44, 0.1  ;;  %1051 = vst.msk [vmem:[#allocation2 + $0x30] sm:$0xff] %vm89_vm0, %v1043_v44 }
 0x5b6   :  { %1052 = vst.msk [vmem:[#allocation2 + $0x38] sm:$0xff] %vm89_vm0, %v1044_v38  ;;  %v1307_v9 = vsel %vm1059_vm12, 1.0, %v1417_v4  ;;  %v1308_v18 = vsel %vm1060_vm6, 1.0, %v1417_v4 }
 0x5b7   :  { %v1407_v55 = vpack.i.bf16 %v1308_v18, %v1307_v9 }
 0x5b9   :  { %1408 = vrot.lane.b32.xlu2 %v1407_v55, %s1418_s23 }
 0x5e3   :  { %v1394_v14 = vpop.permute.xlu2 %1393 }
 0x5e4   :  { %v1396_v54 = vunpack.i.h.bf16 %v1394_v14  ;;  %v1395_v8 = vunpack.i.l.bf16 %v1394_v14 }
 0x5e6   :  { %1110 = vst.msk [vmem:[#allocation2 + $0x8] sm:$0xff] %vm154_vm9, %v1396_v54 }
 0x5e7   :  { %1109 = vst.msk [vmem:[#allocation2] sm:$0xff] %vm154_vm9, %v1395_v8 }
 0x5ed   :  { %v1118_v10 = vld [vmem:[#allocation2 + $0x8] sm:$0xff] }
 0x5ee   :  { %1126 = vst.msk [vmem:[%s2035_s9 + $0x8] sm:$0xff] %vm89_vm0, %v1118_v10  ;;  %v1117_v47 = vld [vmem:[#allocation2] sm:$0xff] }
 0x5ef   :  { %1125 = vst.msk [vmem:[%s2035_s9] sm:$0xff] %vm89_vm0, %v1117_v47 }
 0x613   :  { %v1409_v4 = vpop.permute.xlu2 %1408 }
 0x614   :  { %v1411_v15 = vunpack.i.h.bf16 %v1409_v4  ;;  %v1410_v31 = vunpack.i.l.bf16 %v1409_v4 }
 0x616   :  { %1116 = vst.msk [vmem:[#allocation2 + $0x38] sm:$0xff] %vm154_vm9, %v1411_v15 }
 0x617   :  { %1115 = vst.msk [vmem:[#allocation2 + $0x30] sm:$0xff] %vm154_vm9, %v1410_v31 }
 0x61c   :  { %v1404_v5 = vpop.permute.xlu1 %1403  ;;  %v1399_v30 = vpop.permute.xlu0 %1398 }
 0x61d   :  { %v1124_v45 = vld [vmem:[#allocation2 + $0x38] sm:$0xff]  ;;  %v1406_v32 = vunpack.i.h.bf16 %v1404_v5  ;;  %v1405_v17 = vunpack.i.l.bf16 %v1404_v5  ;;  %v1401_v41 = vunpack.i.h.bf16 %v1399_v30  ;;  %v1400_v42 = vunpack.i.l.bf16 %v1399_v30 }
 0x61e   :  { %1132 = vst.msk [vmem:[%s2035_s9 + $0x38] sm:$0xff] %vm89_vm0, %v1124_v45  ;;  %v1123_v58 = vld [vmem:[#allocation2 + $0x30] sm:$0xff] }
 0x61f   :  { %1131 = vst.msk [vmem:[%s2035_s9 + $0x30] sm:$0xff] %vm89_vm0, %v1123_v58 }
 0x620   :  { %1114 = vst.msk [vmem:[#allocation2 + $0x28] sm:$0xff] %vm154_vm9, %v1406_v32 }
 0x621   :  { %1113 = vst.msk [vmem:[#allocation2 + $0x20] sm:$0xff] %vm154_vm9, %v1405_v17 }
 0x622   :  { %1112 = vst.msk [vmem:[#allocation2 + $0x18] sm:$0xff] %vm154_vm9, %v1401_v41 }
 0x623   :  { %1111 = vst.msk [vmem:[#allocation2 + $0x10] sm:$0xff] %vm154_vm9, %v1400_v42 }
 0x627   :  { %v1122_v60 = vld [vmem:[#allocation2 + $0x28] sm:$0xff] }
 0x628   :  { %1130 = vst.msk [vmem:[%s2035_s9 + $0x28] sm:$0xff] %vm89_vm0, %v1122_v60  ;;  %v1121_v35 = vld [vmem:[#allocation2 + $0x20] sm:$0xff] }
 0x629   :  { %1129 = vst.msk [vmem:[%s2035_s9 + $0x20] sm:$0xff] %vm89_vm0, %v1121_v35  ;;  %v1120_v61 = vld [vmem:[#allocation2 + $0x18] sm:$0xff] }
 0x62a   :  { %1128 = vst.msk [vmem:[%s2035_s9 + $0x18] sm:$0xff] %vm89_vm0, %v1120_v61  ;;  %v1119_v3 = vld [vmem:[#allocation2 + $0x10] sm:$0xff] }
 0x62b   :  { %1127 = vst.msk [vmem:[%s2035_s9 + $0x10] sm:$0xff] %vm89_vm0, %v1119_v3 }

</bundles_post_ra>
